<compile_context>
chip_gen: v7x
topology: tpu7x:2x2x1
jax: 0.10.0
libtpu: 0.0.40
codegen_flags: <defaults>
</compile_context>

<pallas_src>
import jax
import jax.numpy as jnp
from jax import lax
from jax.experimental import pallas as pl
from jax.experimental.pallas import tpu as pltpu

_VMEM_LIMIT_BYTES = 32 * 1024 * 1024   # raise v5e's 16 MiB scoped default; OK on v6e/v7x
_TILE_VMEM_BUDGET = 12 * 1024 * 1024   # budget for buffers that scale with the batch tile


def _mlp_kernel(x_ref, w1_ref, b1_ref, w2_ref, b2_ref, w3_ref, b3_ref, o_ref):
    x = x_ref[...]                                            # [bt, D] f32

    h1 = jnp.dot(x, w1_ref[...], preferred_element_type=jnp.float32) + b1_ref[...]
    h1 = jnp.maximum(h1, 0.0)                                 # [bt, 64]

    h2 = jnp.dot(h1, w2_ref[...], preferred_element_type=jnp.float32) + b2_ref[...]
    h2 = jnp.maximum(h2, 0.0)                                 # [bt, 32]

    # Layer 3: contract w3 [1, 32] with h2 [bt, 32] over the feature axis.
    # Result is [1, bt]: batch lands on lanes, so the store is lane-dense
    # (unmasked vst, wide writeback DMA) with no in-kernel transpose.
    out_row = lax.dot_general(
        w3_ref[...], h2,
        dimension_numbers=(((1,), (1,)), ((), ())),
        preferred_element_type=jnp.float32)                   # [1, bt]
    o_ref[...] = (out_row + b3_ref[...]).astype(o_ref.dtype)  # b3 is [1, 1]


def _choose_batch_tile(B, D, *, max_tile=8192, min_tiles=4,
                       vmem_budget_bytes=_TILE_VMEM_BUDGET):
    """Pick the batch tile (multiple of 128) from an explicit VMEM budget.

    Per batch row the kernel keeps in VMEM:
      x double-buffer 2*D*4  +  h1 64*4  +  h2 32*4  +  out double-buffer 2*4.
    Weights/biases are tile-independent (< 30 KiB double-buffered) and are
    covered by the headroom between the budget and vmem_limit_bytes.
    """
    per_row_bytes = (2 * D + 64 + 32 + 2) * 4
    cap = min(max_tile, max(128, vmem_budget_bytes // per_row_bytes))
    cap = max(128, (cap // 128) * 128)          # lane-dense cap

    # Prefer >= min_tiles grid steps so ("parallel",) can shard across
    # v7x's two TensorCores; a single giant tile wastes half the chip.
    target = -(-B // min_tiles)                  # ceil(B / min_tiles)
    bt = min(cap, max(128, target))
    bt = ((bt + 127) // 128) * 128               # round up to 128 (<= cap, cap aligned)
    return bt


def neural_network_forward(x, params, *, max_batch_tile=8192):
    """3-layer MLP forward pass as a single fused Pallas TPU kernel.

    x: [B, input_dim] float32.
    params: w1 [D,64], b1 [1,64], w2 [64,32], b2 [1,32],
            w3 [1,32] (PyTorch [out,in] layout), b3 [1,1].
    Returns: [B, 1] float32.
    """
    B, D = x.shape
    w1, b1 = params["w1"], params["b1"]
    w2, b2 = params["w2"], params["b2"]
    w3, b3 = params["w3"], params["b3"]

    bt = _choose_batch_tile(B, D, max_tile=max_batch_tile)
    num_tiles = pl.cdiv(B, bt)
    Bp = num_tiles * bt
    if Bp != B:
        x = jnp.pad(x, ((0, Bp - B), (0, 0)))

    def whole(shape):
        # Whole-array block, same block every grid step -> stays VMEM-resident.
        return pl.BlockSpec(shape, lambda i: tuple(0 for _ in shape))

    out = pl.pallas_call(
        _mlp_kernel,
        out_shape=jax.ShapeDtypeStruct((1, Bp), jnp.float32),
        grid_spec=pltpu.PrefetchScalarGridSpec(
            num_scalar_prefetch=0,
            grid=(num_tiles,),
            in_specs=[
                pl.BlockSpec((bt, D), lambda i: (i, 0)),      # x batch tile
                whole(w1.shape), whole(b1.shape),
                whole(w2.shape), whole(b2.shape),
                whole(w3.shape), whole(b3.shape),
            ],
            out_specs=pl.BlockSpec((1, bt), lambda i: (0, i)),  # lane-dense row
        ),
        compiler_params=pltpu.CompilerParams(
            dimension_semantics=("parallel",),                # megacore-shardable
            vmem_limit_bytes=_VMEM_LIMIT_BYTES,
        ),
    )(x, w1, b1, w2, b2, w3, b3)

    return out.reshape(Bp, 1)[:B]


def init_params(key, input_dim):
    """nn.Linear-style U(-1/sqrt(fan_in), +1/sqrt(fan_in)) init.

    w1/w2 stored [in, out] (kernel computes x @ W); w3 stays in the PyTorch
    [out=1, in=32] layout so the kernel contracts it row-wise.
    """
    specs = [("1", input_dim, 64, False), ("2", 64, 32, False), ("3", 32, 1, True)]
    params = {}
    for name, fan_in, fan_out, transposed in specs:
        key, kw, kb = jax.random.split(key, 3)
        bound = 1.0 / (fan_in ** 0.5)
        wshape = (fan_out, fan_in) if transposed else (fan_in, fan_out)
        params[f"w{name}"] = jax.random.uniform(
            kw, wshape, jnp.float32, minval=-bound, maxval=bound)
        params[f"b{name}"] = jax.random.uniform(
            kb, (1, fan_out), jnp.float32, minval=-bound, maxval=bound)
    return params


def reference_forward(x, params):
    h1 = jnp.maximum(x @ params["w1"] + params["b1"], 0.0)
    h2 = jnp.maximum(h1 @ params["w2"] + params["b2"], 0.0)
    return h2 @ params["w3"].T + params["b3"]


if __name__ == "__main__":
    key = jax.random.PRNGKey(0)
    key, kx, kp = jax.random.split(key, 3)

    batch, input_dim = 8, 16
    x = jax.random.normal(kx, (batch, input_dim), dtype=jnp.float32)
    params = init_params(kp, input_dim)

    out = jax.block_until_ready(neural_network_forward(x, params))
    ref = reference_forward(x, params)
    assert out.shape == (batch, 1)
    assert jnp.allclose(out, ref, atol=1e-4, rtol=1e-4)

    # Exercise the multi-tile + padded path (bt chosen per VMEM budget, >1 tile).
    big_b = 1040
    xb = jax.random.normal(kx, (big_b, input_dim), dtype=jnp.float32)
    outb = jax.block_until_ready(neural_network_forward(xb, params))
    refb = reference_forward(xb, params)
    assert outb.shape == (big_b, 1)
    assert jnp.allclose(outb, refb, atol=1e-4, rtol=1e-4)

    print("KERNEL_OK")
</pallas_src>

<mosaic_0001>
module attributes {stable_mosaic.version = 11 : i64} {
  func.func @_mlp_kernel(%arg0: i32, %arg1: memref<128x16xf32, #tpu.memory_space<vmem>>, %arg2: memref<16x64xf32, #tpu.memory_space<vmem>>, %arg3: memref<1x64xf32, #tpu.memory_space<vmem>>, %arg4: memref<64x32xf32, #tpu.memory_space<vmem>>, %arg5: memref<1x32xf32, #tpu.memory_space<vmem>>, %arg6: memref<1x32xf32, #tpu.memory_space<vmem>>, %arg7: memref<1x1xf32, #tpu.memory_space<vmem>>, %arg8: memref<1x128xf32, #tpu.memory_space<vmem>>) attributes {dimension_semantics = [#tpu.dimension_semantics<parallel>], iteration_bounds = array<i64: 1>, scalar_prefetch = 0 : i64, scratch_operands = 0 : i64, tpu.core_type = #tpu.core_type<tc>, window_params = [{transform_indices = @transform_0, window_bounds = array<i64: 128, 16>}, {pipeline_mode = #tpu.pipeline_mode<synchronous>, transform_indices = @transform_1, window_bounds = array<i64: 16, 64>}, {pipeline_mode = #tpu.pipeline_mode<synchronous>, transform_indices = @transform_2, window_bounds = array<i64: 1, 64>}, {pipeline_mode = #tpu.pipeline_mode<synchronous>, transform_indices = @transform_3, window_bounds = array<i64: 64, 32>}, {pipeline_mode = #tpu.pipeline_mode<synchronous>, transform_indices = @transform_4, window_bounds = array<i64: 1, 32>}, {pipeline_mode = #tpu.pipeline_mode<synchronous>, transform_indices = @transform_5, window_bounds = array<i64: 1, 32>}, {pipeline_mode = #tpu.pipeline_mode<synchronous>, transform_indices = @transform_6, window_bounds = array<i64: 1, 1>}, {transform_indices = @transform_7, window_bounds = array<i64: 1, 128>}]} {
    %c0 = arith.constant 0 : index
    %c0_0 = arith.constant 0 : index
    %0 = vector.load %arg1[%c0, %c0_0] : memref<128x16xf32, #tpu.memory_space<vmem>>, vector<128x16xf32>
    %c0_1 = arith.constant 0 : index
    %c0_2 = arith.constant 0 : index
    %1 = vector.load %arg2[%c0_1, %c0_2] : memref<16x64xf32, #tpu.memory_space<vmem>>, vector<16x64xf32>
    %cst = arith.constant dense<0.000000e+00> : vector<128x64xf32>
    %2 = tpu.matmul %0, %1, %cst {dimension_numbers = #tpu.dot_dimension_numbers<[1], [0], [0], [1], [0, 0, 1, 1], [], []>} : vector<128x16xf32>, vector<16x64xf32>, vector<128x64xf32> -> vector<128x64xf32>
    %c0_3 = arith.constant 0 : index
    %c0_4 = arith.constant 0 : index
    %3 = vector.load %arg3[%c0_3, %c0_4] : memref<1x64xf32, #tpu.memory_space<vmem>>, vector<1x64xf32>
    %4 = vector.broadcast %3 : vector<1x64xf32> to vector<128x64xf32>
    %5 = arith.addf %2, %4 : vector<128x64xf32>
    %cst_5 = arith.constant 0.000000e+00 : f32
    %6 = vector.broadcast %cst_5 : f32 to vector<128x64xf32>
    %7 = arith.maximumf %5, %6 : vector<128x64xf32>
    %c0_6 = arith.constant 0 : index
    %c0_7 = arith.constant 0 : index
    %8 = vector.load %arg4[%c0_6, %c0_7] : memref<64x32xf32, #tpu.memory_space<vmem>>, vector<64x32xf32>
    %cst_8 = arith.constant dense<0.000000e+00> : vector<128x32xf32>
    %9 = tpu.matmul %7, %8, %cst_8 {dimension_numbers = #tpu.dot_dimension_numbers<[1], [0], [0], [1], [0, 0, 1, 1], [], []>} : vector<128x64xf32>, vector<64x32xf32>, vector<128x32xf32> -> vector<128x32xf32>
    %c0_9 = arith.constant 0 : index
    %c0_10 = arith.constant 0 : index
    %10 = vector.load %arg5[%c0_9, %c0_10] : memref<1x32xf32, #tpu.memory_space<vmem>>, vector<1x32xf32>
    %11 = vector.broadcast %10 : vector<1x32xf32> to vector<128x32xf32>
    %12 = arith.addf %9, %11 : vector<128x32xf32>
    %cst_11 = arith.constant 0.000000e+00 : f32
    %13 = vector.broadcast %cst_11 : f32 to vector<128x32xf32>
    %14 = arith.maximumf %12, %13 : vector<128x32xf32>
    %c0_12 = arith.constant 0 : index
    %c0_13 = arith.constant 0 : index
    %15 = vector.load %arg6[%c0_12, %c0_13] : memref<1x32xf32, #tpu.memory_space<vmem>>, vector<1x32xf32>
    %cst_14 = arith.constant dense<0.000000e+00> : vector<1x128xf32>
    %16 = tpu.matmul %15, %14, %cst_14 {dimension_numbers = #tpu.dot_dimension_numbers<[1], [1], [0], [0], [0, 0, 1, 0], [], []>} : vector<1x32xf32>, vector<128x32xf32>, vector<1x128xf32> -> vector<1x128xf32>
    %c0_15 = arith.constant 0 : index
    %c0_16 = arith.constant 0 : index
    %17 = vector.load %arg7[%c0_15, %c0_16] : memref<1x1xf32, #tpu.memory_space<vmem>>, vector<1x1xf32>
    %18 = vector.broadcast %17 : vector<1x1xf32> to vector<1x128xf32>
    %19 = arith.addf %16, %18 : vector<1x128xf32>
    %c0_17 = arith.constant 0 : index
    %c0_18 = arith.constant 0 : index
    %20 = vector.load %arg8[%c0_17, %c0_18] : memref<1x128xf32, #tpu.memory_space<vmem>>, vector<1x128xf32>
    tpu.vector_store %arg8[%c0_17, %c0_18], %19 {strides = array<i32>} : memref<1x128xf32, #tpu.memory_space<vmem>>, vector<1x128xf32>,
    return
  }
  func.func @transform_0(%arg0: i32) -> (i32, i32) {
    %c0_i32 = arith.constant 0 : i32
    %c0_i32_0 = arith.constant 0 : i32
    return %arg0, %c0_i32 : i32, i32
  }
  func.func @transform_1(%arg0: i32) -> (i32, i32) {
    %c0_i32 = arith.constant 0 : i32
    %c0_i32_0 = arith.constant 0 : i32
    %c0_i32_1 = arith.constant 0 : i32
    return %c0_i32, %c0_i32_0 : i32, i32
  }
  func.func @transform_2(%arg0: i32) -> (i32, i32) {
    %c0_i32 = arith.constant 0 : i32
    %c0_i32_0 = arith.constant 0 : i32
    %c0_i32_1 = arith.constant 0 : i32
    return %c0_i32, %c0_i32_0 : i32, i32
  }
  func.func @transform_3(%arg0: i32) -> (i32, i32) {
    %c0_i32 = arith.constant 0 : i32
    %c0_i32_0 = arith.constant 0 : i32
    %c0_i32_1 = arith.constant 0 : i32
    return %c0_i32, %c0_i32_0 : i32, i32
  }
  func.func @transform_4(%arg0: i32) -> (i32, i32) {
    %c0_i32 = arith.constant 0 : i32
    %c0_i32_0 = arith.constant 0 : i32
    %c0_i32_1 = arith.constant 0 : i32
    return %c0_i32, %c0_i32_0 : i32, i32
  }
  func.func @transform_5(%arg0: i32) -> (i32, i32) {
    %c0_i32 = arith.constant 0 : i32
    %c0_i32_0 = arith.constant 0 : i32
    %c0_i32_1 = arith.constant 0 : i32
    return %c0_i32, %c0_i32_0 : i32, i32
  }
  func.func @transform_6(%arg0: i32) -> (i32, i32) {
    %c0_i32 = arith.constant 0 : i32
    %c0_i32_0 = arith.constant 0 : i32
    %c0_i32_1 = arith.constant 0 : i32
    return %c0_i32, %c0_i32_0 : i32, i32
  }
  func.func @transform_7(%arg0: i32) -> (i32, i32) {
    %c0_i32 = arith.constant 0 : i32
    %c0_i32_0 = arith.constant 0 : i32
    return %c0_i32, %arg0 : i32, i32
  }
}

</mosaic_0001>

<bundles_post_ra>
// kernel: tpu_custom_call.1
= control target key start
LH: loop header
LB: loop body
LE: loop exit
PB: predicated region body
PF: predicated region fallthrough
CT: control target
= control target key end

     0   :  { %s1142_s0 = inlined_call_operand.vmem [shape: f32[128,16], index: 0, kind: input, shape index: {}]   ;;  %s1143_s1 = inlined_call_operand.vmem [shape: f32[16,64], index: 1, kind: input, shape index: {}]   ;;  %s1144_s2 = inlined_call_operand.vmem [shape: f32[1,64], index: 2, kind: input, shape index: {}]   ;;  %s1145_s3 = inlined_call_operand.vmem [shape: f32[64,32], index: 3, kind: input, shape index: {}]   ;;  %s1146_s4 = inlined_call_operand.vmem [shape: f32[1,32], index: 4, kind: input, shape index: {}]   ;;  %s1147_s5 = inlined_call_operand.vmem [shape: f32[1,32], index: 5, kind: input, shape index: {}]   ;;  %s1148_s6 = inlined_call_operand.<no memory space> [shape: f32[1,1], index: 6, kind: input, shape index: {}]   ;;  %s1149_s7 = inlined_call_operand.hbm [shape: f32[1,128], index: 7, kind: output, shape index: {}]  }
   0x1   :  { %v12_v0 = vstv %s1148_s6 }
   0x2   :  { %13 = vst [vmem:[#allocation2] sm:$0x1] %v12_v0 }
   0x3   :  { %v45_v1 = vld [vmem:[%s1143_s1] sm:$0xff]  ;;  %v46_v2 = vld [vmem:[%s1143_s1 + $0x8] sm:$0xff]  ;;  %vm54_vm0 = vcmask 130048   ;;  %v31_v6 = vld [vmem:[%s1142_s0 + $0x10] sm:$0xff] }
   0x4   :  { %v29_v3 = vld [vmem:[%s1142_s0] sm:$0xff]  ;;  %v850_v4 = vpack.c.bf16 %v46_v2, %v45_v1  ;;  %v30_v5 = vld [vmem:[%s1142_s0 + $0x8] sm:$0xff]  ;;  %v266_v9 = vld [vmem:[%s1145_s3 + $0x10] sm:$0xff] }
   0x5   :  { %751 = vmatprep.mubr.msk.f32.mxu1 %vm54_vm0, %v29_v3  ;;  %v264_v7 = vld [vmem:[%s1145_s3] sm:$0xff]  ;;  %v265_v8 = vld [vmem:[%s1145_s3 + $0x8] sm:$0xff]  ;;  %v32_v10 = vld [vmem:[%s1142_s0 + $0x18] sm:$0xff] }
   0x6   :  { %851 = vmatprep.subr.bf16.mxu1 %v850_v4  ;;  %v854_v11 = vpack.c.bf16 %v265_v8, %v264_v7  ;;  %v267_v12 = vld [vmem:[%s1145_s3 + $0x18] sm:$0xff]  ;;  %v268_v14 = vld [vmem:[%s1145_s3 + $0x20] sm:$0xff]  ;;  %v269_v15 = vld [vmem:[%s1145_s3 + $0x28] sm:$0xff] }
   0x7   :  { %853 = vmatpush3.bf16.msra.mxu1 %v850_v4  ;;  %v858_v13 = vpack.c.bf16 %v267_v12, %v266_v9 }
   0xa   :  { %752 = vmatmul.mubr.msk.f32.vlgmr.msra.gmra.mrb[0].mxu1 %vm54_vm0, %v30_v5 }
   0xb   :  { %754 = vmatprep.mubr.msk.f32.mxu1 %vm54_vm0, %v31_v6 }
   0xc   :  { %14 = vsyncpa [#allocation4], 0  ;;  %v33_v16 = vld [vmem:[%s1142_s0 + $0x20] sm:$0xff]  ;;  %855 = vmatprep.subr.bf16.mxu1 %v854_v11  ;;  %v862_v17 = vpack.c.bf16 %v269_v15, %v268_v14  ;;  %v34_v18 = vld [vmem:[%s1142_s0 + $0x28] sm:$0xff]  ;;  %vm279_vm1 = vcmask 523264   ;;  %vm933_vm2 = vmmov 0  }
   0xd   :  { %857 = vmatpush3.bf16.msra.mxu1 %v854_v11  ;;  %v270_v19 = vld [vmem:[%s1145_s3 + $0x30] sm:$0xff]  ;;  %v271_v20 = vld [vmem:[%s1145_s3 + $0x38] sm:$0xff]  ;;  %v37_v24 = vld [vmem:[%s1142_s0 + $0x40] sm:$0xff]  ;;  %vm500_vm3 = vcmask 261120   ;;  %s936_s30 = smov [#allocation3]  }
   0xe   :  { %755 = vmatmul.mubr.msk.f32.gmra.mrb[2].mxu1 %vm54_vm0, %v32_v10  ;;  %859 = vmatprep.subr.bf16.mxu1 %v858_v13  ;;  %v35_v21 = vld [vmem:[%s1142_s0 + $0x30] sm:$0xff]  ;;  %v866_v22 = vpack.c.bf16 %v271_v20, %v270_v19  ;;  %v36_v23 = vld [vmem:[%s1142_s0 + $0x38] sm:$0xff]  ;;  %v38_v25 = vld [vmem:[%s1142_s0 + $0x48] sm:$0xff]  ;;  %v935_v20 = vmov 0   ;;  %s629_s8 = sshll.u32 %s936_s30, 4  ;;  %s630_s8 = int_to_ptr.vmem [resolvable:$true] %s629_s8 }
   0xf   :  { %757 = vmatprep.mubr.msk.f32.mxu1 %vm54_vm0, %v33_v16  ;;  %v39_v26 = vld [vmem:[%s1142_s0 + $0x50] sm:$0xff]  ;;  %v40_v27 = vld [vmem:[%s1142_s0 + $0x58] sm:$0xff]  ;;  %v41_v28 = vld [vmem:[%s1142_s0 + $0x60] sm:$0xff]  ;;  %907 = vset.pattern.permute.xlu0 %v935_v20  ;;  %s908_s6 = scalar_lea.vmem %s630_s8, 16  ;;  %s912_s9 = scalar_lea.vmem %s630_s8, 32 }
  0x10   :  { %v42_v29 = vld [vmem:[%s1142_s0 + $0x68] sm:$0xff]  ;;  %v43_v30 = vld [vmem:[%s1142_s0 + $0x70] sm:$0xff]  ;;  %v44_v31 = vld [vmem:[%s1142_s0 + $0x78] sm:$0xff]  ;;  %p909_p0 = scmp.ne.s32.totalorder %s630_s8, %s908_s6  ;;  %p913_p1 = scmp.lt.s32.totalorder %s630_s8, %s630_s8 }
  0x11   :  { %861 = vmatpush3.bf16.msra.mxu1 %v858_v13  ;;  %v637_v32 = vld [vmem:[%s1144_s2] ss:$0 sm:$0xff]  ;;  %vm1099_vm4 = vmpackc.low %vm500_vm3, %vm500_vm3  ;;  %p914_p2 = scmp.lt.s32.totalorder %s912_s9, %s908_s6 }
  0x12   :  { %758 = vmatmul.mubr.msk.f32.gmra.mrb[4].mxu1 %vm54_vm0, %v34_v18  ;;  %863 = vmatprep.subr.bf16.mxu1 %v862_v17  ;;  %v934_v18 = vmov 0.0   ;;  %v490_v19 = vld [vmem:[#allocation2] sm:$0x1] }
  0x13   :  { %760 = vmatprep.mubr.msk.f32.mxu1 %vm54_vm0, %v35_v21  ;;  %847 = vmatprep.mubr.msk.f32.mxu0 %vm933_vm2, %v934_v18  ;;  %v654_v21 = vld [vmem:[%s1146_s4] ss:$0 sm:$0xff]  ;;  %p915_p3 = por %p914_p2, %p913_p1 }
  0x14   :  { %493 = vperm.xlu0 %907, %v490_v19  }
  0x15   :  { %865 = vmatpush3.bf16.msra.mxu1 %v862_v17  ;;  %v932_v17 = vmov 0.0|0.0   ;;  %p916_p4 = pnand %p915_p3, %p909_p0 }
  0x16   :  { %761 = vmatmul.mubr.msk.f32.gmra.mrb[6].mxu1 %vm54_vm0, %v36_v23  ;;  %867 = vmatprep.subr.bf16.mxu1 %v866_v22 }
  0x17   :  { %763 = vmatprep.mubr.msk.f32.mxu1 %vm54_vm0, %v37_v24  ;;  %870 = vmatprep.subr.bf16.mxu0 %v932_v17 }
  0x19   :  { %869 = vmatpush3.bf16.msra.mxu1 %v866_v22 }
  0x1a   :  { %764 = vmatmul.mubr.msk.f32.gmra.mrb[8].mxu1 %vm54_vm0, %v38_v25 }
  0x1b   :  { %766 = vmatprep.mubr.msk.f32.mxu1 %vm54_vm0, %v39_v26 }
  0x1e   :  { %767 = vmatmul.mubr.msk.f32.gmra.mrb[10].mxu1 %vm54_vm0, %v40_v27 }
  0x1f   :  { %769 = vmatprep.mubr.msk.f32.mxu1 %vm54_vm0, %v41_v28 }
  0x22   :  { %770 = vmatmul.mubr.msk.f32.gmra.mrb[12].mxu1 %vm54_vm0, %v42_v29 }
  0x23   :  { %772 = vmatprep.mubr.msk.f32.mxu1 %vm54_vm0, %v43_v30 }
  0x26   :  { %773 = vmatmul.mubr.msk.f32.gmra.mrb[14].mxu1 %vm54_vm0, %v44_v31 }
  0x93   :  { %v494_v20 = vpop.permute.xlu0 %493 }
  0xdd   :  { %v753_v33 = vpop.f32.mrb[0].mxu1 }
  0xde   :  { %v175_v34 = vadd.f32 %v753_v33, %v637_v32  ;;  %v169_v35 = vpop.f32.mrb[1].mxu1 }
  0xdf   :  { %v170_v36 = vadd.f32 %v637_v32, %v169_v35 }
  0xe0   :  { %v249_v39 = vmax.f32 %v175_v34, 0.0 }
  0xe1   :  { %v248_v37 = vmax.f32 %v170_v36, 0.0  ;;  %v756_v38 = vpop.f32.mrb[2].mxu1 }
  0xe2   :  { %v185_v40 = vadd.f32 %v756_v38, %v637_v32  ;;  %v179_v41 = vpop.f32.mrb[3].mxu1 }
  0xe3   :  { %v180_v42 = vadd.f32 %v637_v32, %v179_v41  ;;  %791 = vmatprep.mubr.msk.f32.mxu1 %vm279_vm1, %v248_v37 }
  0xe4   :  { %v251_v43 = vmax.f32 %v185_v40, 0.0  ;;  %792 = vmatmul.mubr.msk.f32.vlgmr.msra.gmra.mrb[16].mxu1 %vm279_vm1, %v249_v39 }
  0xe5   :  { %v250_v44 = vmax.f32 %v180_v42, 0.0  ;;  %v759_v45 = vpop.f32.mrb[4].mxu1 }
  0xe6   :  { %v195_v46 = vadd.f32 %v759_v45, %v637_v32  ;;  %v189_v47 = vpop.f32.mrb[5].mxu1 }
  0xe7   :  { %794 = vmatprep.mubr.msk.f32.mxu1 %vm279_vm1, %v250_v44  ;;  %v190_v48 = vadd.f32 %v637_v32, %v189_v47 }
  0xe8   :  { %795 = vmatmul.mubr.msk.f32.gmra.mrb[18].mxu1 %vm279_vm1, %v251_v43  ;;  %v253_v49 = vmax.f32 %v195_v46, 0.0 }
  0xe9   :  { %v252_v50 = vmax.f32 %v190_v48, 0.0  ;;  %v762_v51 = vpop.f32.mrb[6].mxu1 }
  0xea   :  { %v205_v52 = vadd.f32 %v762_v51, %v637_v32  ;;  %v199_v53 = vpop.f32.mrb[7].mxu1 }
  0xeb   :  { %797 = vmatprep.mubr.msk.f32.mxu1 %vm279_vm1, %v252_v50  ;;  %v200_v54 = vadd.f32 %v637_v32, %v199_v53 }
  0xec   :  { %798 = vmatmul.mubr.msk.f32.gmra.mrb[20].mxu1 %vm279_vm1, %v253_v49  ;;  %v255_v55 = vmax.f32 %v205_v52, 0.0 }
  0xed   :  { %v254_v56 = vmax.f32 %v200_v54, 0.0  ;;  %v765_v57 = vpop.f32.mrb[8].mxu1 }
  0xee   :  { %v215_v58 = vadd.f32 %v765_v57, %v637_v32  ;;  %v209_v59 = vpop.f32.mrb[9].mxu1 }
  0xef   :  { %800 = vmatprep.mubr.msk.f32.mxu1 %vm279_vm1, %v254_v56  ;;  %v210_v60 = vadd.f32 %v637_v32, %v209_v59 }
  0xf0   :  { %801 = vmatmul.mubr.msk.f32.gmra.mrb[22].mxu1 %vm279_vm1, %v255_v55  ;;  %v257_v61 = vmax.f32 %v215_v58, 0.0 }
  0xf1   :  { %v256_v62 = vmax.f32 %v210_v60, 0.0  ;;  %v768_v63 = vpop.f32.mrb[10].mxu1 }
  0xf2   :  { %v225_v0 = vadd.f32 %v768_v63, %v637_v32  ;;  %v219_v1 = vpop.f32.mrb[11].mxu1 }
  0xf3   :  { %803 = vmatprep.mubr.msk.f32.mxu1 %vm279_vm1, %v256_v62  ;;  %v220_v2 = vadd.f32 %v637_v32, %v219_v1 }
  0xf4   :  { %804 = vmatmul.mubr.msk.f32.gmra.mrb[24].mxu1 %vm279_vm1, %v257_v61  ;;  %v259_v3 = vmax.f32 %v225_v0, 0.0 }
  0xf5   :  { %v258_v4 = vmax.f32 %v220_v2, 0.0  ;;  %v771_v5 = vpop.f32.mrb[12].mxu1 }
  0xf6   :  { %v235_v6 = vadd.f32 %v771_v5, %v637_v32  ;;  %v229_v7 = vpop.f32.mrb[13].mxu1 }
  0xf7   :  { %806 = vmatprep.mubr.msk.f32.mxu1 %vm279_vm1, %v258_v4  ;;  %v230_v8 = vadd.f32 %v637_v32, %v229_v7 }
  0xf8   :  { %807 = vmatmul.mubr.msk.f32.gmra.mrb[26].mxu1 %vm279_vm1, %v259_v3  ;;  %v261_v9 = vmax.f32 %v235_v6, 0.0 }
  0xf9   :  { %v260_v10 = vmax.f32 %v230_v8, 0.0  ;;  %v774_v11 = vpop.f32.mrb[14].mxu1 }
  0xfa   :  { %v245_v12 = vadd.f32 %v774_v11, %v637_v32  ;;  %v239_v13 = vpop.f32.mrb[15].mxu1 }
  0xfb   :  { %809 = vmatprep.mubr.msk.f32.mxu1 %vm279_vm1, %v260_v10  ;;  %v240_v14 = vadd.f32 %v637_v32, %v239_v13 }
  0xfc   :  { %810 = vmatmul.mubr.msk.f32.gmra.mrb[28].mxu1 %vm279_vm1, %v261_v9  ;;  %v263_v15 = vmax.f32 %v245_v12, 0.0 }
  0xfd   :  { %v262_v16 = vmax.f32 %v240_v14, 0.0 }
  0xff   :  { %812 = vmatprep.mubr.msk.f32.mxu1 %vm279_vm1, %v262_v16  ;;  %v496_v16 = vlaneseq }
 0x100   :  { %813 = vmatmul.mubr.msk.f32.gmra.mrb[30].mxu1 %vm279_vm1, %v263_v15  ;;  %v489_v15 = vld [vmem:[%s1147_s5] sm:$0x1] }
 0x101   :  { %v497_v18 = vshrl.u32 %v496_v16, 7 }
 0x103   :  { %v498_v19 = vsub.s32 0, %v497_v18 }
 0x1b7   :  { %v793_v22 = vpop.f32.mrb[16].mxu1 }
 0x1b8   :  { %v400_v23 = vadd.f32 %v793_v22, %v654_v21  ;;  %v394_v24 = vpop.f32.mrb[17].mxu1 }
 0x1b9   :  { %v395_v25 = vadd.f32 %v654_v21, %v394_v24 }
 0x1ba   :  { %v474_v26 = vmax.f32 %v400_v23, 0.0 }
 0x1bb   :  { %v473_v27 = vmax.f32 %v395_v25, 0.0  ;;  %v796_v28 = vpop.f32.mrb[18].mxu1 }
 0x1bc   :  { %v410_v29 = vadd.f32 %v796_v28, %v654_v21  ;;  %v404_v30 = vpop.f32.mrb[19].mxu1 }
 0x1bd   :  { %v871_v32 = vpack.c.bf16 %v474_v26, %v473_v27  ;;  %v405_v33 = vadd.f32 %v654_v21, %v404_v30 }
 0x1be   :  { %v476_v34 = vmax.f32 %v410_v29, 0.0 }
 0x1bf   :  { %v475_v35 = vmax.f32 %v405_v33, 0.0  ;;  %873 = vmatpush3.bf16.xpose.msk.msra.mxu0 %vm1099_vm4, %v871_v32  ;;  %v799_v36 = vpop.f32.mrb[20].mxu1 }
 0x1c0   :  { %v420_v37 = vadd.f32 %v799_v36, %v654_v21  ;;  %v414_v38 = vpop.f32.mrb[21].mxu1  ;;  %874 = vmatprep.subr.bf16.mxu0 %v932_v17 }
 0x1c1   :  { %v875_v39 = vpack.c.bf16 %v476_v34, %v475_v35  ;;  %v415_v40 = vadd.f32 %v654_v21, %v414_v38 }
 0x1c2   :  { %v478_v41 = vmax.f32 %v420_v37, 0.0 }
 0x1c3   :  { %v477_v42 = vmax.f32 %v415_v40, 0.0  ;;  %v802_v43 = vpop.f32.mrb[22].mxu1 }
 0x1c4   :  { %v430_v44 = vadd.f32 %v802_v43, %v654_v21  ;;  %v424_v45 = vpop.f32.mrb[23].mxu1 }
 0x1c5   :  { %v879_v46 = vpack.c.bf16 %v478_v41, %v477_v42  ;;  %v425_v47 = vadd.f32 %v654_v21, %v424_v45 }
 0x1c6   :  { %v480_v48 = vmax.f32 %v430_v44, 0.0 }
 0x1c7   :  { %877 = vmatpush3.bf16.xpose.msk.msra.mxu0 %vm1099_vm4, %v875_v39  ;;  %v479_v49 = vmax.f32 %v425_v47, 0.0  ;;  %v805_v50 = vpop.f32.mrb[24].mxu1 }
 0x1c8   :  { %878 = vmatprep.subr.bf16.mxu0 %v932_v17  ;;  %v440_v51 = vadd.f32 %v805_v50, %v654_v21  ;;  %v434_v52 = vpop.f32.mrb[25].mxu1 }
 0x1c9   :  { %v883_v53 = vpack.c.bf16 %v480_v48, %v479_v49  ;;  %v435_v54 = vadd.f32 %v654_v21, %v434_v52 }
 0x1ca   :  { %v482_v55 = vmax.f32 %v440_v51, 0.0 }
 0x1cb   :  { %v481_v56 = vmax.f32 %v435_v54, 0.0  ;;  %v808_v57 = vpop.f32.mrb[26].mxu1 }
 0x1cc   :  { %v450_v58 = vadd.f32 %v808_v57, %v654_v21  ;;  %v444_v59 = vpop.f32.mrb[27].mxu1 }
 0x1cd   :  { %v887_v60 = vpack.c.bf16 %v482_v55, %v481_v56  ;;  %v445_v61 = vadd.f32 %v654_v21, %v444_v59 }
 0x1ce   :  { %v484_v62 = vmax.f32 %v450_v58, 0.0 }
 0x1cf   :  { %881 = vmatpush3.bf16.xpose.msk.msra.mxu0 %vm1099_vm4, %v879_v46  ;;  %v483_v63 = vmax.f32 %v445_v61, 0.0  ;;  %v811_v0 = vpop.f32.mrb[28].mxu1 }
 0x1d0   :  { %882 = vmatprep.subr.bf16.mxu0 %v932_v17  ;;  %v460_v1 = vadd.f32 %v811_v0, %v654_v21  ;;  %v454_v2 = vpop.f32.mrb[29].mxu1 }
 0x1d1   :  { %v891_v3 = vpack.c.bf16 %v484_v62, %v483_v63  ;;  %v455_v4 = vadd.f32 %v654_v21, %v454_v2 }
 0x1d2   :  { %v486_v5 = vmax.f32 %v460_v1, 0.0 }
 0x1d3   :  { %v485_v6 = vmax.f32 %v455_v4, 0.0  ;;  %v814_v7 = vpop.f32.mrb[30].mxu1 }
 0x1d4   :  { %v470_v8 = vadd.f32 %v814_v7, %v654_v21  ;;  %v464_v9 = vpop.f32.mrb[31].mxu1 }
 0x1d5   :  { %v895_v10 = vpack.c.bf16 %v486_v5, %v485_v6  ;;  %v465_v11 = vadd.f32 %v654_v21, %v464_v9  ;;  %v499_v21 = vrot.slane %v494_v20, %v498_v19 }
 0x1d6   :  { %v488_v12 = vmax.f32 %v470_v8, 0.0 }
 0x1d7   :  { %885 = vmatpush3.bf16.xpose.msk.msra.mxu0 %vm1099_vm4, %v883_v53  ;;  %v487_v13 = vmax.f32 %v465_v11, 0.0 }
 0x1d8   :  { %886 = vmatprep.subr.bf16.mxu0 %v932_v17 }
 0x1d9   :  { %v899_v14 = vpack.c.bf16 %v488_v12, %v487_v13 }
 0x1df   :  { %889 = vmatpush3.bf16.xpose.msk.msra.mxu0 %vm1099_vm4, %v887_v60 }
 0x1e0   :  { %890 = vmatprep.subr.bf16.mxu0 %v932_v17 }
 0x1e7   :  { %893 = vmatpush3.bf16.xpose.msk.msra.mxu0 %vm1099_vm4, %v891_v3 }
 0x1e8   :  { %894 = vmatprep.subr.bf16.mxu0 %v932_v17 }
 0x1ef   :  { %897 = vmatpush3.bf16.xpose.msk.msra.mxu0 %vm1099_vm4, %v895_v10 }
 0x1f0   :  { %898 = vmatprep.subr.bf16.mxu0 %v932_v17 }
 0x1f7   :  { %901 = vmatpush3.bf16.xpose.msk.msra.mxu0 %vm1099_vm4, %v899_v14 }
 0x1fe   :  { %848 = vmatmul.mubr.msk.f32.vlgmr.msra.gmra.mrb[0].mxu0 %vm500_vm3, %v489_v15 }
 0x2d1   :  { %v618_v22 = vpop.f32.mrb[0].mxu0 }
 0x2d2   :  { %v619_v23 = vadd.f32 %v618_v22, %v499_v21  ;;  %v849_v24 = vpop.f32.mrb[1].mxu0 }
 0x2d4   :  { %622 = vst [vmem:[#allocation3] sm:$0x1] %v619_v23 }
 0x2d5   :  { %919 = shalt.err (!%p916_p4)
}
 0x2d6   :  { %s920_s11 = scalar_lea.hbm %s1149_s7, 16 }
 0x2d7   :  { %p921_p5 = scmp.ne.s32.totalorder %s1149_s7, %s920_s11  ;;  %p924_p6 = scmp.lt.u32.totalorder %s920_s11, %s1149_s7 }
 0x2d9   :  { %p926_p7 = pnand %p924_p6, %p921_p5 }
 0x2db   :  { %929 = shalt.err (!%p926_p7)
}
 0x2dc   :  { %632 = dma.vmem_to_hbm [thread:$0]  %s630_s8, 16, %s1149_s7, [#allocation4]  }
 0x2dd   :  { %930 = dma.done.wait [#allocation4], 16  }
 0x2de   :  { %931 = vsyncadd [#allocation4], 4294967280 }
 0x2df   :  { %636 = vsyncpa [#allocation4], 1 }

</bundles_post_ra>
